<compile_context>
chip_gen: v5e
topology: v5e:2x2
jax: 0.10.0
libtpu: 0.0.40
codegen_flags: <defaults>
</compile_context>

<pallas_src>
import functools

import jax
import jax.numpy as jnp
from jax.experimental import pallas as pl
from jax.experimental.pallas import tpu as pltpu


def _round_up(x, m):
    return (x + m - 1) // m * m


def _sublane_multiple(dtype):
    # Native sublane packing: f32 -> 8, bf16/f16 -> 16, int8/fp8 -> 32.
    return {4: 8, 2: 16, 1: 32}.get(jnp.dtype(dtype).itemsize, 8)


def _select_tile_rows(batch, num_classes, out_dtype, tgt_dtype):
    """Pick the batch tile TB from C and dtype for this HBM-streaming kernel."""
    lanes = _round_up(max(num_classes, 1), 128)          # VMEM lane padding
    bytes_per_row = lanes * (jnp.dtype(out_dtype).itemsize
                             + jnp.dtype(tgt_dtype).itemsize)
    sub = max(_sublane_multiple(out_dtype), _sublane_multiple(tgt_dtype))

    target_step_bytes = 2 * 1024 * 1024      # ~2 MiB of inputs per grid step
    vmem_input_budget = 32 * 1024 * 1024     # 2 inputs x 2 buffers, v7x-safe

    tb = max(target_step_bytes // bytes_per_row, sub)
    tb = min(tb, max(vmem_input_budget // (2 * bytes_per_row), sub))
    tb = max(sub, (tb // sub) * sub)
    tb = min(tb, _round_up(batch, sub))
    return int(tb)


def _dhb_kernel(outputs_ref, targets_ref, beta_ref, loss_ref, *, batch, inv_batch):
    i = pl.program_id(0)
    tb = outputs_ref.shape[0]

    logits = outputs_ref[...].astype(jnp.float32)        # (TB, C)
    tgt = targets_ref[...].astype(jnp.float32)           # (TB, C)
    beta = beta_ref[...].astype(jnp.float32)             # (TB, 1)

    # Numerically stable log-softmax pieces along the class (lane) axis.
    m = jnp.max(logits, axis=1, keepdims=True)           # (TB, 1)
    shifted = logits - m                                  # (TB, C)
    e = jnp.exp(shifted)                                  # single EUP pass
    log_sum = jnp.log(jnp.sum(e, axis=1, keepdims=True))  # (TB, 1)

    # Soft-target CE:  -beta * sum_c (shifted - log_sum) * tgt
    # Hard bootstrap:  (1-beta) * (-ls[argmax]) = (1-beta) * log_sum
    row_dot = jnp.sum(shifted * tgt, axis=1, keepdims=True)   # (TB, 1)
    sum_tgt = jnp.sum(tgt, axis=1, keepdims=True)              # (TB, 1)
    row_loss = (1.0 - beta) * log_sum + beta * (log_sum * sum_tgt - row_dot)

    # Mask rows of the (possibly partial) last tile instead of padding in HBM.
    rows = i * tb + jax.lax.broadcasted_iota(jnp.int32, (tb, 1), 0)
    row_loss = jnp.where(rows < batch, row_loss, 0.0)

    loss_ref[...] = (jnp.sum(row_loss) * inv_batch).reshape(1, 1, 1)


def dynamic_hard_bootstrapping(outputs, targets, beta, *, tb=None):
    """outputs: (B, C), targets: (B, C), beta: (B,) -> scalar loss (float32)."""
    B, C = outputs.shape
    beta2d = beta.reshape(B, 1)

    sub = max(_sublane_multiple(outputs.dtype), _sublane_multiple(targets.dtype))
    if tb is None:
        tb = _select_tile_rows(B, C, outputs.dtype, targets.dtype)
    else:
        tb = max(sub, _round_up(int(tb), sub))

    num_tiles = -(-B // tb)                                  # cdiv
    kernel = functools.partial(_dhb_kernel, batch=B, inv_batch=1.0 / B)

    partials = pl.pallas_call(
        kernel,
        out_shape=jax.ShapeDtypeStruct((num_tiles, 1, 1), jnp.float32),
        grid=(num_tiles,),
        in_specs=[
            pl.BlockSpec((tb, C), lambda i: (i, 0)),   # logits tile (pipelined)
            pl.BlockSpec((tb, C), lambda i: (i, 0)),   # targets tile
            pl.BlockSpec((tb, 1), lambda i: (i, 0)),   # beta tile
        ],
        # One partial per grid step -> no carried accumulator, megacore-safe.
        out_specs=pl.BlockSpec((1, 1, 1), lambda i: (i, 0, 0)),
        compiler_params=pltpu.CompilerParams(
            dimension_semantics=("parallel",),
            vmem_limit_bytes=48 * 1024 * 1024,
        ),
    )(outputs, targets, beta2d)
    return jnp.sum(partials)


def _reference(outputs, targets, beta):
    """Pure-JAX mirror of the PyTorch DynamicHardBootstrapping forward."""
    outputs = outputs.astype(jnp.float32)
    targets = targets.astype(jnp.float32)
    B = outputs.shape[0]
    b = beta.reshape(-1, 1).astype(jnp.float32)
    ls = jax.nn.log_softmax(outputs, axis=1)
    hard_idx = jnp.argmax(jax.nn.softmax(outputs, axis=1), axis=1)       # (B,)
    loss_hard = -jnp.take_along_axis(ls, hard_idx[:, None], axis=1)      # (B, 1)
    dce = -(b * ls * targets).sum() / B
    return dce + ((1.0 - b) * loss_hard).sum() / B


if __name__ == "__main__":
    key = jax.random.PRNGKey(0)

    # Case 1: small, non-multiple-of-8 batch -> exercises the masked last tile.
    k1, k2, k3, k4, k5, k6 = jax.random.split(key, 6)
    B1, C1 = 13, 32
    out1 = jax.random.normal(k1, (B1, C1), dtype=jnp.float32)
    tgt1 = jax.nn.softmax(jax.random.normal(k2, (B1, C1), dtype=jnp.float32), axis=1)
    beta1 = jax.random.uniform(k3, (B1,), dtype=jnp.float32)

    loss1 = jax.block_until_ready(dynamic_hard_bootstrapping(out1, tgt1, beta1))
    ref1 = _reference(out1, tgt1, beta1)
    assert jnp.allclose(loss1, ref1, rtol=1e-5, atol=1e-5), (loss1, ref1)

    # Case 2: multi-tile grid with a partial last tile (tb override for testing).
    B2, C2 = 40, 96
    out2 = jax.random.normal(k4, (B2, C2), dtype=jnp.float32)
    tgt2 = jax.nn.softmax(jax.random.normal(k5, (B2, C2), dtype=jnp.float32), axis=1)
    beta2 = jax.random.uniform(k6, (B2,), dtype=jnp.float32)

    loss2 = jax.block_until_ready(dynamic_hard_bootstrapping(out2, tgt2, beta2, tb=16))
    ref2 = _reference(out2, tgt2, beta2)
    assert jnp.allclose(loss2, ref2, rtol=1e-5, atol=1e-5), (loss2, ref2)

    print("KERNEL_OK")
</pallas_src>

<mosaic_0001>
module attributes {stable_mosaic.version = 11 : i64} {
  func.func @_dhb_kernel(%arg0: i32, %arg1: memref<16x32xf32, #tpu.memory_space<vmem>>, %arg2: memref<16x32xf32, #tpu.memory_space<vmem>>, %arg3: memref<16x1xf32, #tpu.memory_space<vmem>>, %arg4: memref<1x1x1xf32, #tpu.memory_space<vmem>>) attributes {dimension_semantics = [#tpu.dimension_semantics<parallel>], iteration_bounds = array<i64: 1>, scalar_prefetch = 0 : i64, scratch_operands = 0 : i64, tpu.core_type = #tpu.core_type<tc>, window_params = [{transform_indices = @transform_0, window_bounds = array<i64: 16, 32>}, {transform_indices = @transform_1, window_bounds = array<i64: 16, 32>}, {transform_indices = @transform_2, window_bounds = array<i64: 16, 1>}, {transform_indices = @transform_3, window_bounds = array<i64: 1, 1, 1>}]} {
    %c0 = arith.constant 0 : index
    %c0_0 = arith.constant 0 : index
    %0 = vector.load %arg1[%c0, %c0_0] : memref<16x32xf32, #tpu.memory_space<vmem>>, vector<16x32xf32>
    %c0_1 = arith.constant 0 : index
    %c0_2 = arith.constant 0 : index
    %1 = vector.load %arg2[%c0_1, %c0_2] : memref<16x32xf32, #tpu.memory_space<vmem>>, vector<16x32xf32>
    %c0_3 = arith.constant 0 : index
    %c0_4 = arith.constant 0 : index
    %2 = vector.load %arg3[%c0_3, %c0_4] : memref<16x1xf32, #tpu.memory_space<vmem>>, vector<16x1xf32>
    %cst = arith.constant dense<0xFF800000> : vector<16xf32>
    %3 = vector.multi_reduction <maximumf>, %0, %cst [1] : vector<16x32xf32> to vector<16xf32>
    %4 = vector.shape_cast %3 : vector<16xf32> to vector<16x1xf32>
    %5 = vector.broadcast %4 : vector<16x1xf32> to vector<16x32xf32>
    %6 = arith.subf %0, %5 : vector<16x32xf32>
    %7 = math.exp %6 : vector<16x32xf32>
    %cst_5 = arith.constant dense<0.000000e+00> : vector<16xf32>
    %8 = vector.multi_reduction <add>, %7, %cst_5 [1] : vector<16x32xf32> to vector<16xf32>
    %9 = vector.shape_cast %8 : vector<16xf32> to vector<16x1xf32>
    %10 = math.log %9 : vector<16x1xf32>
    %11 = arith.mulf %6, %1 : vector<16x32xf32>
    %cst_6 = arith.constant dense<0.000000e+00> : vector<16xf32>
    %12 = vector.multi_reduction <add>, %11, %cst_6 [1] : vector<16x32xf32> to vector<16xf32>
    %13 = vector.shape_cast %12 : vector<16xf32> to vector<16x1xf32>
    %cst_7 = arith.constant dense<0.000000e+00> : vector<16xf32>
    %14 = vector.multi_reduction <add>, %1, %cst_7 [1] : vector<16x32xf32> to vector<16xf32>
    %15 = vector.shape_cast %14 : vector<16xf32> to vector<16x1xf32>
    %cst_8 = arith.constant 1.000000e+00 : f32
    %16 = vector.broadcast %cst_8 : f32 to vector<16x1xf32>
    %17 = arith.subf %16, %2 : vector<16x1xf32>
    %18 = arith.mulf %17, %10 : vector<16x1xf32>
    %19 = arith.mulf %10, %15 : vector<16x1xf32>
    %20 = arith.subf %19, %13 : vector<16x1xf32>
    %21 = arith.mulf %2, %20 : vector<16x1xf32>
    %22 = arith.addf %18, %21 : vector<16x1xf32>
    %c16_i32 = arith.constant 16 : i32
    %23 = arith.muli %arg0, %c16_i32 : i32
    %24 = tpu.iota {dimensions = array<i32: 0>} : vector<16x1xi32>
    %25 = vector.broadcast %23 : i32 to vector<16x1xi32>
    %26 = arith.addi %25, %24 : vector<16x1xi32>
    %c13_i32 = arith.constant 13 : i32
    %27 = vector.broadcast %c13_i32 : i32 to vector<16x1xi32>
    %28 = arith.cmpi slt, %26, %27 : vector<16x1xi32>
    %cst_9 = arith.constant 0.000000e+00 : f32
    %29 = vector.broadcast %cst_9 : f32 to vector<16x1xf32>
    %30 = arith.select %28, %22, %29 : vector<16x1xi1>, vector<16x1xf32>
    %31 = vector.shape_cast %30 : vector<16x1xf32> to vector<1x16x1xf32>
    %cst_10 = arith.constant dense<0.000000e+00> : vector<1xf32>
    %32 = vector.multi_reduction <add>, %31, %cst_10 [1, 2] : vector<1x16x1xf32> to vector<1xf32>
    %33 = vector.shape_cast %32 : vector<1xf32> to vector<1x1x1xf32>
    %34 = vector.extract %33[0, 0, 0] : f32 from vector<1x1x1xf32>
    %cst_11 = arith.constant 0.0769230798 : f32
    %35 = arith.mulf %34, %cst_11 : f32
    %36 = vector.broadcast %35 : f32 to vector<1x1x1xf32>
    %c0_12 = arith.constant 0 : index
    %c0_13 = arith.constant 0 : index
    %c0_14 = arith.constant 0 : index
    %37 = vector.load %arg4[%c0_12, %c0_13, %c0_14] : memref<1x1x1xf32, #tpu.memory_space<vmem>>, vector<1x1x1xf32>
    tpu.vector_store %arg4[%c0_12, %c0_13, %c0_14], %36 {strides = array<i32>} : memref<1x1x1xf32, #tpu.memory_space<vmem>>, vector<1x1x1xf32>,
    return
  }
  func.func @transform_0(%arg0: i32) -> (i32, i32) {
    %c0_i32 = arith.constant 0 : i32
    %c0_i32_0 = arith.constant 0 : i32
    return %arg0, %c0_i32 : i32, i32
  }
  func.func @transform_1(%arg0: i32) -> (i32, i32) {
    %c0_i32 = arith.constant 0 : i32
    %c0_i32_0 = arith.constant 0 : i32
    return %arg0, %c0_i32 : i32, i32
  }
  func.func @transform_2(%arg0: i32) -> (i32, i32) {
    %c0_i32 = arith.constant 0 : i32
    %c0_i32_0 = arith.constant 0 : i32
    return %arg0, %c0_i32 : i32, i32
  }
  func.func @transform_3(%arg0: i32) -> (i32, i32, i32) {
    %c0_i32 = arith.constant 0 : i32
    %c0_i32_0 = arith.constant 0 : i32
    %c0_i32_1 = arith.constant 0 : i32
    return %arg0, %c0_i32, %c0_i32_0 : i32, i32, i32
  }
}

</mosaic_0001>

<bundles_post_ra>
// kernel: tpu_custom_call.1
= control target key start
LH: loop header
LB: loop body
LE: loop exit
PB: predicated region body
PF: predicated region fallthrough
CT: control target
= control target key end

     0   :  { %8 = vsyncpa [#allocation3], 0  ;;  %s247_s0 = inlined_call_operand.vmem [shape: f32[13,32], index: 0, kind: input, shape index: {}]   ;;  %s248_s1 = inlined_call_operand.hbm [shape: f32[13,32], index: 1, kind: input, shape index: {}]   ;;  %s249_s2 = inlined_call_operand.vmem [shape: f32[13,1], index: 2, kind: input, shape index: {}]   ;;  %s250_s3 = inlined_call_operand.hbm [shape: f32[1,1,1], index: 3, kind: output, shape index: {}]  }
   0x1   :  { %9 = vsyncpa [#allocation4], 0  ;;  %s16_s14 = sshll.u32 %s248_s1, 4  ;;  %s197_s15 = smov [#allocation2]   ;;  %s17_s14 = int_to_ptr.hbm [resolvable:$true] %s16_s14 }
   0x2   :  { %s18_s16 = sshll.u32 %s197_s15, 4  ;;  %s198_s17 = smov 128   ;;  %s19_s16 = int_to_ptr.vmem [resolvable:$true] %s18_s16 }
   0x3   :  { %s199_s18 = smov 8  }
   0x4   :  { %24 = dma.hbm_to_vmem [thread:$0]  %s17_s14, 256, %s19_s16, [#allocation3], %s198_s17, %s198_s17, %s199_s18  }
   0x5   :  { %193 = dma.done.wait [#allocation3], 256  }
   0x6   :  { %194 = vsyncadd [#allocation3], 4294967040  ;;  %vm37_vm0 = vcmask 261120   ;;  %v32_v0 = vld [vmem:[%s247_s0 + $0x8] sm:$0xff]  ;;  %v31_v2 = vld [vmem:[%s247_s0] sm:$0xff]  ;;  %v87_v27 = vlaneseq  ;;  %vm97_vm2 = vcmask 7168  }
   0x7   :  { %v41_v1 = vsel %vm37_vm0, %v32_v0, -inf  ;;  %v38_v3 = vsel %vm37_vm0, %v31_v2, -inf  ;;  %v34_v4 = vld [vmem:[#allocation2 + $0x8] sm:$0xff]  ;;  %v33_v6 = vld [vmem:[#allocation2] sm:$0xff]  ;;  %s121_s28 = sshll.u32 %s250_s3, 4  ;;  %vm112_vm3 = vcmask 0   ;;  %s122_s28 = int_to_ptr.hbm [resolvable:$true] %s121_s28 }
   0x8   :  { %42 = vmax.xlane.f32.xlu0 %v41_v1  ;;  %v71_v5 = vsel %vm37_vm0, %v34_v4, 0.0  ;;  %v68_v7 = vsel %vm37_vm0, %v33_v6, 0.0  ;;  %v36_v28 = vld [vmem:[%s249_s2 + $0x8] sm:$0xff]  ;;  %v88_v32 = vshrl.u32 %v87_v27, 7  ;;  %v35_v35 = vld [vmem:[%s249_s2] sm:$0xff]  ;;  %s200_s2 = smov [#allocation5]  }
   0x9   :  { %72 = vadd.xlane.f32.xlu2 %v71_v5  ;;  %v75_v33 = vsub.f32 1.0, %v36_v28  ;;  %v74_v41 = vsub.f32 1.0, %v35_v35  ;;  %s119_s25 = sshll.u32 %s200_s2, 4  ;;  %s120_s25 = int_to_ptr.vmem [resolvable:$true] %s119_s25 }
   0xa   :  { %v89_v39 = vadd.s32 8, %v88_v32 }
   0xc   :  { %vm94_vm1 = vcmp.lt.s32.totalorder %v89_v39, 13 }
  0x10   :  { %39 = vmax.xlane.f32.xlu0 %v38_v3 }
  0x11   :  { %69 = vadd.xlane.f32.xlu2 %v68_v7 }
  0x7b   :  { %v43_v8 = vpop.xlane.xlu0 %42 }
  0x7c   :  { %v45_v9 = vsub.f32 %v32_v0, %v43_v8  ;;  %v73_v23 = vpop.xlane.xlu2 %72 }
  0x7e   :  { %v48_v10 = vmul.f32 1.442695, %v45_v9  ;;  %v61_v11 = vmul.f32 %v45_v9, %v34_v4 }
  0x80   :  { %137 = vpow2.f32 %v48_v10  ;;  %v65_v12 = vsel %vm37_vm0, %v61_v11, 0.0 }
  0x81   :  { %66 = vadd.xlane.f32.xlu0 %v65_v12 }
  0x83   :  { %v40_v13 = vpop.xlane.xlu0 %39 }
  0x84   :  { %v44_v14 = vsub.f32 %v31_v2, %v40_v13  ;;  %v70_v37 = vpop.xlane.xlu2 %69 }
  0x86   :  { %v138_v15 = vpop.eup %137  ;;  %v46_v16 = vmul.f32 1.442695, %v44_v14  ;;  %v60_v20 = vmul.f32 %v44_v14, %v33_v6 }
  0x87   :  { %v53_v17 = vsel %vm37_vm0, %v138_v15, 0.0 }
  0x88   :  { %139 = vpow2.f32 %v46_v16  ;;  %54 = vadd.xlane.f32.xlu1 %v53_v17  ;;  %v62_v21 = vsel %vm37_vm0, %v60_v20, 0.0 }
  0x8e   :  { %v140_v18 = vpop.eup %139 }
  0x8f   :  { %v50_v19 = vsel %vm37_vm0, %v140_v18, 0.0 }
  0x90   :  { %51 = vadd.xlane.f32.xlu1 %v50_v19 }
  0x98   :  { %63 = vadd.xlane.f32.xlu1 %v62_v21 }
  0xf4   :  { %v67_v30 = vpop.xlane.xlu0 %66 }
  0xfb   :  { %v55_v22 = vpop.xlane.xlu1 %54 }
  0xfc   :  { %141 = vlog2.f32 %v55_v22 }
 0x102   :  { %v142_v24 = vpop.eup %141 }
 0x103   :  { %v59_v25 = vmul.f32 0.6931472, %v142_v24  ;;  %v52_v26 = vpop.xlane.xlu1 %51 }
 0x104   :  { %143 = vlog2.f32 %v52_v26 }
 0x105   :  { %v79_v29 = vmul.f32 %v73_v23, %v59_v25  ;;  %v77_v40 = vmul.f32 %v75_v33, %v59_v25 }
 0x107   :  { %v81_v31 = vsub.f32 %v79_v29, %v67_v30 }
 0x109   :  { %v83_v36 = vmul.f32 %v81_v31, %v36_v28 }
 0x10a   :  { %v144_v34 = vpop.eup %143 }
 0x10b   :  { %v57_v38 = vmul.f32 0.6931472, %v144_v34  ;;  %v64_v43 = vpop.xlane.xlu1 %63  ;;  %v85_v44 = vadd.f32 %v83_v36, %v77_v40 }
 0x10d   :  { %v78_v42 = vmul.f32 %v70_v37, %v57_v38  ;;  %v76_v46 = vmul.f32 %v74_v41, %v57_v38  ;;  %v96_v48 = vsel %vm94_vm1, %v85_v44, 0.0 }
 0x10e   :  { %v99_v51 = vsel %vm97_vm2, %v96_v48, 0.0 }
 0x10f   :  { %v80_v45 = vsub.f32 %v78_v42, %v64_v43 }
 0x111   :  { %v82_v47 = vmul.f32 %v80_v45, %v35_v35 }
 0x113   :  { %v84_v49 = vadd.f32 %v82_v47, %v76_v46 }
 0x115   :  { %v98_v50 = vsel %vm97_vm2, %v84_v49, 0.0 }
 0x116   :  { %v100_v52 = vadd.f32 %v99_v51, %v98_v50 }
 0x118   :  { %101 = vadd.xlane.f32.xlu2 %v100_v52 }
 0x18b   :  { %v102_v53 = vpop.xlane.xlu2 %101 }
 0x18c   :  { %v103_v54 = vrot.slane %v102_v53, 4 }
 0x18e   :  { %v104_v55 = vadd.f32 %v103_v54, %v102_v53 }
 0x190   :  { %v105_v56 = vrot.slane %v104_v55, 2 }
 0x192   :  { %v106_v57 = vadd.f32 %v105_v56, %v104_v55 }
 0x194   :  { %v107_v58 = vrot.slane %v106_v57, 1 }
 0x196   :  { %v108_v59 = vadd.f32 %v107_v58, %v106_v57 }
 0x198   :  { %131 = vpush %v108_v59 }
 0x1c9   :  { %s132_s29 = spop %131 }
 0x1ca   :  { %s110_s30 = smul.f32 0.07692308, %s132_s29 }
 0x1cc   :  { %v111_v60 = vstv %s110_s30 }
 0x1cd   :  { %113 = vst.msk [vmem:[#allocation5] sm:$0x1] %vm112_vm3, %v111_v60 }
 0x1ce   :  { %124 = dma.vmem_to_hbm [thread:$0]  %s120_s25, 16, %s122_s28, [#allocation4]  }
 0x1cf   :  { %195 = dma.done.wait [#allocation4], 16  }
 0x1d0   :  { %196 = vsyncadd [#allocation4], 4294967280 }
 0x1d1   :  { %129 = vsyncpa [#allocation3], 1 }
 0x1d2   :  { %130 = vsyncpa [#allocation4], 1 }

</bundles_post_ra>
